<compile_context>
chip_gen: v7x
topology: tpu7x:2x2x1
jax: 0.10.0
libtpu: 0.0.40
codegen_flags: <defaults>
</compile_context>

<pallas_src>
import functools

import numpy as np

import jax
import jax.numpy as jnp
from jax.experimental import pallas as pl
from jax.experimental.pallas import tpu as pltpu


# ----------------------------------------------------------------------------
# Kernels
# ----------------------------------------------------------------------------
def _depthwise_conv(x_ref, w_ref, m_ref, k, W, HW):
    """Depthwise k x k 'same' conv on a [nb, cb, H*W] block, f32 accumulate."""
    p = (k - 1) // 2
    xf = x_ref[...].astype(jnp.float32)          # [nb, cb, HW]
    w = w_ref[...].astype(jnp.float32)           # [k*k, cb, 1]
    m = m_ref[...].astype(jnp.float32)           # [k*k, HW] (exact 0/1 in bf16)
    center = p * k + p
    # Center tap: its validity mask is all ones -> init the accumulator from it
    # directly (saves the zeros fill, one full-block add and one mask multiply).
    acc = xf * w[center]
    # TODO(synk): for bf16 inputs on v6e/v7x (VALU-bound there) the tap multiply
    # could run in bf16; kept f32 for exact parity with the f32 reference.
    # TODO(synk): for k >= 5, switch to incremental small-shift rolls if bundle
    # dumps show the XLU (vrot) slots co-binding with the VALU.
    for i in range(k):
        for j in range(k):
            t = i * k + j
            if t == center:
                continue
            dh, dw = i - p, j - p
            shift = (-(dh * W + dw)) % HW        # static non-negative rotation
            tap = pltpu.roll(xf, shift, 2) if shift else xf
            mw = m[t:t + 1, :] * w[t]            # [cb, HW]: mask folded into weight
            acc = acc + tap * mw
    return acc


def _sfrelu_kernel(k, W, HW, n_red, eps,
                   x_ref, w_ref, g_ref, b_ref, m_ref, o_ref):
    """Single-pass path: the whole batch for one channel block is resident."""
    acc = _depthwise_conv(x_ref, w_ref, m_ref, k, W, HW)        # [N, cb, HW] f32
    inv_n = 1.0 / float(n_red)
    mean = jnp.sum(acc, axis=(0, 2), keepdims=True) * inv_n     # [1, cb, 1]
    d = acc - mean
    # Exact two-pass variance (acc is resident in VMEM): no E[x^2]-E[x]^2
    # cancellation.
    var = jnp.sum(d * d, axis=(0, 2), keepdims=True) * inv_n    # [1, cb, 1]
    scale = jax.lax.rsqrt(var + eps) * g_ref[...]
    f = d * scale + b_ref[...]
    # Re-read x (still resident in VMEM) instead of keeping a long-lived f32 copy.
    x = x_ref[...].astype(jnp.float32)
    z = f - x
    o_ref[...] = (z * jax.nn.sigmoid(z) + x).astype(o_ref.dtype)


def _sfrelu_twopass_kernel(k, W, HW, n_red, eps,
                           x_ref, w_ref, g_ref, b_ref, m_ref, o_ref,
                           shift_ref, s_ref, ss_ref):
    """Two-pass path: grid = (channel blocks, pass, batch blocks)."""
    p_idx = pl.program_id(1)      # 0: stats pass, 1: normalize + silu pass
    n_idx = pl.program_id(2)      # batch block
    acc = _depthwise_conv(x_ref, w_ref, m_ref, k, W, HW)        # [nb, cb, HW] f32

    @pl.when(p_idx == 0)
    def _():
        @pl.when(n_idx == 0)
        def _():
            nb_, _, hw_ = acc.shape
            # Per-channel shift (mean of the first batch block) keeps the
            # streamed sum / sum-of-squares numerically safe (shifted variance).
            shift_ref[...] = (jnp.sum(acc, axis=(0, 2), keepdims=True)
                              / float(nb_ * hw_))
            s_ref[...] = jnp.zeros_like(s_ref)
            ss_ref[...] = jnp.zeros_like(ss_ref)
        d = acc - shift_ref[...]
        s_ref[...] += jnp.sum(d, axis=(0, 2), keepdims=True)
        ss_ref[...] += jnp.sum(d * d, axis=(0, 2), keepdims=True)

    @pl.when(p_idx == 1)
    def _():
        inv_n = 1.0 / float(n_red)
        sm = s_ref[...] * inv_n                                  # E[acc - shift]
        var = jnp.maximum(ss_ref[...] * inv_n - sm * sm, 0.0)
        mean = shift_ref[...] + sm
        scale = jax.lax.rsqrt(var + eps) * g_ref[...]
        f = (acc - mean) * scale + b_ref[...]
        x = x_ref[...].astype(jnp.float32)
        z = f - x
        o_ref[...] = (z * jax.nn.sigmoid(z) + x).astype(o_ref.dtype)


# ----------------------------------------------------------------------------
# Wrapper
# ----------------------------------------------------------------------------
def _vmem_budget():
    """(block-sizing budget, vmem_limit_bytes) per TPU generation."""
    try:
        kind = jax.devices()[0].device_kind.lower()
    except Exception:
        kind = ""
    is_v7 = ("v7" in kind) or ("tpu7" in kind) or ("tpu 7" in kind)
    if is_v7:                       # v7x: 64 MiB VMEM per TensorCore
        return 40 * (1 << 20), 48 * (1 << 20)
    return 88 * (1 << 20), 100 * (1 << 20)   # v5e / v6e: 128 MiB physical


def _block_bytes(nb, cb, HW, itemsize, kk):
    """Conservative VMEM estimate for one grid step."""
    big = nb * cb * HW
    b = 4 * big * itemsize          # input + output, double-buffered
    b += 3 * big * 4                # f32 in-kernel temps (x upcast, acc, rolled tap)
    b += 2 * kk * HW * 2            # bf16 masks, double-buffered
    b += 4 * kk * cb * 4            # taps + affine params
    b += 64 << 10                   # slack (scratch padding etc.)
    return b


def _build_masks(H, W, k):
    """Static per-tap 'same'-padding validity masks, bf16 (exact 0/1)."""
    p = (k - 1) // 2
    hh, ww = np.meshgrid(np.arange(H), np.arange(W), indexing="ij")
    m = np.empty((k * k, H * W), np.float32)
    for i in range(k):
        for j in range(k):
            dh, dw = i - p, j - p
            valid = ((hh + dh >= 0) & (hh + dh < H) &
                     (ww + dw >= 0) & (ww + dw < W))
            m[i * k + j] = valid.reshape(-1).astype(np.float32)
    return jnp.asarray(m, dtype=jnp.bfloat16)


def sfrelu_pallas(x_nchw, weight, gamma, beta, k, eps=1e-5, *,
                  block_bytes_limit=None, two_pass=None):
    """x: [N,C,H,W]; weight: [C,1,k,k] depthwise; gamma/beta: [C].

    block_bytes_limit overrides the auto VMEM budget; two_pass=None picks the
    path automatically (True/False forces it, used for testing).
    """
    assert k % 2 == 1, "k must be odd (module auto-corrects even k before this)"
    N, C, H, W = x_nchw.shape
    HW = H * W
    kk = k * k
    itemsize = jnp.dtype(x_nchw.dtype).itemsize
    sub = 8 * max(1, 4 // itemsize)            # sublane packing granularity

    # Pad C to the sublane granularity: keeps the pipeline + bounded per-block
    # footprint (instead of the old cb=C / grid-length-1 fallback).
    pad_c = (-C) % sub
    Cp = C + pad_c
    if pad_c:
        x_p = jnp.pad(x_nchw, ((0, 0), (0, pad_c), (0, 0), (0, 0)))
        weight = jnp.pad(weight, ((0, pad_c), (0, 0), (0, 0), (0, 0)))
        gamma = jnp.pad(gamma, (0, pad_c))
        beta = jnp.pad(beta, (0, pad_c))
    else:
        x_p = x_nchw

    budget, vmem_limit = _vmem_budget()
    if block_bytes_limit is not None:
        budget = block_bytes_limit

    cands = [c for c in range(sub, Cp + 1, sub) if Cp % c == 0]

    # Largest channel tile whose full-batch block fits the budget.
    cb = None
    for c in reversed(cands):
        if _block_bytes(N, c, HW, itemsize, kk) <= budget:
            cb = c
            break
    if cb is not None and Cp // cb < 2:
        # Prefer >=2 channel blocks (pipeline overlap; both v7x TensorCores) as
        # long as each block still moves >= 1 MiB.
        alt = [c for c in cands if Cp // c >= 2]
        if alt and N * alt[-1] * HW * itemsize >= (1 << 20):
            cb = alt[-1]

    use_two_pass = two_pass if two_pass is not None else (cb is None)

    # Free reshapes only (channel pad above is the only extra copy, and only
    # when C is not a multiple of the sublane granularity).
    xr = x_p.reshape(N, Cp, HW)
    w = jnp.transpose(weight.reshape(Cp, kk), (1, 0)).reshape(kk, Cp, 1)
    w = w.astype(jnp.float32)
    g = gamma.reshape(Cp, 1).astype(jnp.float32)
    b = beta.reshape(Cp, 1).astype(jnp.float32)
    masks = _build_masks(H, W, k)
    n_red = N * HW

    if not use_two_pass:
        if cb is None:
            cb = cands[0]
        kern = functools.partial(_sfrelu_kernel, k, W, HW, n_red, eps)
        out = pl.pallas_call(
            kern,
            out_shape=jax.ShapeDtypeStruct((N, Cp, HW), x_nchw.dtype),
            grid_spec=pltpu.PrefetchScalarGridSpec(
                num_scalar_prefetch=0,
                grid=(Cp // cb,),
                in_specs=[
                    pl.BlockSpec((N, cb, HW), lambda c: (0, c, 0)),      # x
                    pl.BlockSpec((kk, cb, 1), lambda c: (0, c, 0)),      # taps
                    pl.BlockSpec((cb, 1), lambda c: (c, 0)),             # gamma
                    pl.BlockSpec((cb, 1), lambda c: (c, 0)),             # beta
                    pl.BlockSpec((kk, HW), lambda c: (0, 0)),            # masks
                ],
                out_specs=pl.BlockSpec((N, cb, HW), lambda c: (0, c, 0)),
            ),
            compiler_params=pltpu.CompilerParams(
                dimension_semantics=("parallel",),
                vmem_limit_bytes=vmem_limit),
        )(xr, w, g, b, masks)
        return out.reshape(N, Cp, H, W)[:, :C]

    # ---- two-pass path: tile the batch axis, stream BN statistics ----------
    best = None
    for c in cands:
        for n_ in (d for d in range(1, N + 1) if N % d == 0):
            if _block_bytes(n_, c, HW, itemsize, kk) <= budget:
                if best is None or n_ * c > best[0] * best[1]:
                    best = (n_, c)
    if best is None:
        best = (1, sub)   # let the compiler try; see H-tiling TODO at the top
    nb, cb = best

    kern = functools.partial(_sfrelu_twopass_kernel, k, W, HW, n_red, eps)
    out = pl.pallas_call(
        kern,
        out_shape=jax.ShapeDtypeStruct((N, Cp, HW), x_nchw.dtype),
        grid_spec=pltpu.PrefetchScalarGridSpec(
            num_scalar_prefetch=0,
            grid=(Cp // cb, 2, N // nb),
            in_specs=[
                pl.BlockSpec((nb, cb, HW), lambda c, p, n: (n, c, 0)),   # x
                pl.BlockSpec((kk, cb, 1), lambda c, p, n: (0, c, 0)),    # taps
                pl.BlockSpec((cb, 1), lambda c, p, n: (c, 0)),           # gamma
                pl.BlockSpec((cb, 1), lambda c, p, n: (c, 0)),           # beta
                pl.BlockSpec((kk, HW), lambda c, p, n: (0, 0)),          # masks
            ],
            # Park the output on batch-block 0 during the stats pass (p == 0):
            # the block index only changes once real pass-1 data has been
            # written, so no garbage block is flushed and writes stay single.
            out_specs=pl.BlockSpec((nb, cb, HW), lambda c, p, n: (n * p, c, 0)),
            scratch_shapes=[pltpu.VMEM((1, cb, 1), jnp.float32)] * 3,
        ),
        compiler_params=pltpu.CompilerParams(
            dimension_semantics=("parallel", "arbitrary", "arbitrary"),
            vmem_limit_bytes=vmem_limit),
    )(xr, w, g, b, masks)
    return out.reshape(N, Cp, H, W)[:, :C]


# ----------------------------------------------------------------------------
# Pure-JAX reference (matches PyTorch SFReLU.forward, train-mode BN)
# ----------------------------------------------------------------------------
def sfrelu_reference(x_nchw, weight, gamma, beta, k, eps=1e-5):
    C = x_nchw.shape[1]
    p = (k - 1) // 2
    f = jax.lax.conv_general_dilated(
        x_nchw, weight, window_strides=(1, 1), padding=((p, p), (p, p)),
        dimension_numbers=("NCHW", "OIHW", "NCHW"), feature_group_count=C)
    mean = jnp.mean(f, axis=(0, 2, 3), keepdims=True)
    var = jnp.mean((f - mean) ** 2, axis=(0, 2, 3), keepdims=True)
    fn = (f - mean) * jax.lax.rsqrt(var + eps)
    fn = fn * gamma.reshape(1, C, 1, 1) + beta.reshape(1, C, 1, 1)
    z = fn - x_nchw
    return z * jax.nn.sigmoid(z) + x_nchw


if __name__ == "__main__":
    N, C, H, W = 2, 4, 16, 16
    k = 3                     # odd kernel size (module auto-corrects even k)

    key = jax.random.PRNGKey(0)
    kx, kw, kg, kb = jax.random.split(key, 4)
    x = jax.random.normal(kx, (N, C, H, W), dtype=jnp.float32)
    weight = jax.random.normal(kw, (C, 1, k, k), dtype=jnp.float32) * 0.3
    gamma = 1.0 + 0.1 * jax.random.normal(kg, (C,), dtype=jnp.float32)
    beta = 0.1 * jax.random.normal(kb, (C,), dtype=jnp.float32)

    ref = jax.block_until_ready(sfrelu_reference(x, weight, gamma, beta, k))

    # Path 1: fused single-pass kernel (auto tile sizing).
    out = jax.block_until_ready(sfrelu_pallas(x, weight, gamma, beta, k))
    assert out.shape == (N, C, H, W)
    assert jnp.allclose(out, ref, atol=1e-4, rtol=1e-4), (
        f"single-pass max abs diff {jnp.max(jnp.abs(out - ref))}")

    # Path 2: force the two-pass (batch-tiled BN stats) path with a small
    # block budget so the streaming-statistics code is exercised too.
    out2 = jax.block_until_ready(
        sfrelu_pallas(x, weight, gamma, beta, k,
                      two_pass=True, block_bytes_limit=150_000))
    assert jnp.allclose(out2, ref, atol=1e-4, rtol=1e-4), (
        f"two-pass max abs diff {jnp.max(jnp.abs(out2 - ref))}")

    print("KERNEL_OK")
</pallas_src>

<mosaic_0001>
module attributes {stable_mosaic.version = 11 : i64} {
  func.func @_sfrelu_kernel(%arg0: i32, %arg1: memref<2x8x256xf32, #tpu.memory_space<vmem>>, %arg2: memref<9x8x1xf32, #tpu.memory_space<vmem>>, %arg3: memref<8x1xf32, #tpu.memory_space<vmem>>, %arg4: memref<8x1xf32, #tpu.memory_space<vmem>>, %arg5: memref<9x256xbf16, #tpu.memory_space<vmem>>, %arg6: memref<2x8x256xf32, #tpu.memory_space<vmem>>) attributes {dimension_semantics = [#tpu.dimension_semantics<parallel>], iteration_bounds = array<i64: 1>, scalar_prefetch = 0 : i64, scratch_operands = 0 : i64, tpu.core_type = #tpu.core_type<tc>, window_params = [{transform_indices = @transform_0, window_bounds = array<i64: 2, 8, 256>}, {transform_indices = @transform_1, window_bounds = array<i64: 9, 8, 1>}, {transform_indices = @transform_2, window_bounds = array<i64: 8, 1>}, {transform_indices = @transform_3, window_bounds = array<i64: 8, 1>}, {pipeline_mode = #tpu.pipeline_mode<synchronous>, transform_indices = @transform_4, window_bounds = array<i64: 9, 256>}, {transform_indices = @transform_5, window_bounds = array<i64: 2, 8, 256>}]} {
    %c0 = arith.constant 0 : index
    %c0_0 = arith.constant 0 : index
    %c0_1 = arith.constant 0 : index
    %0 = vector.load %arg1[%c0, %c0_0, %c0_1] : memref<2x8x256xf32, #tpu.memory_space<vmem>>, vector<2x8x256xf32>
    %c0_2 = arith.constant 0 : index
    %c0_3 = arith.constant 0 : index
    %c0_4 = arith.constant 0 : index
    %1 = vector.load %arg2[%c0_2, %c0_3, %c0_4] : memref<9x8x1xf32, #tpu.memory_space<vmem>>, vector<9x8x1xf32>
    %c0_5 = arith.constant 0 : index
    %c0_6 = arith.constant 0 : index
    %2 = vector.load %arg5[%c0_5, %c0_6] : memref<9x256xbf16, #tpu.memory_space<vmem>>, vector<9x256xbf16>
    %3 = arith.extf %2 : vector<9x256xbf16> to vector<9x256xf32>
    %4 = vector.extract_strided_slice %1 {offsets = [4, 0, 0], sizes = [1, 8, 1], strides = [1, 1, 1]} : vector<9x8x1xf32> to vector<1x8x1xf32>
    %5 = vector.shape_cast %4 : vector<1x8x1xf32> to vector<8x1xf32>
    %6 = vector.shape_cast %5 : vector<8x1xf32> to vector<1x8x1xf32>
    %7 = vector.broadcast %6 : vector<1x8x1xf32> to vector<2x8x256xf32>
    %8 = arith.mulf %0, %7 : vector<2x8x256xf32>
    %c17_i32 = arith.constant 17 : i32
    %9 = tpu.dynamic_rotate %0 by %c17_i32 dim 2 : vector<2x8x256xf32>, i32 -> vector<2x8x256xf32>
    %10 = vector.extract_strided_slice %3 {offsets = [0, 0], sizes = [1, 256], strides = [1, 1]} : vector<9x256xf32> to vector<1x256xf32>
    %11 = vector.extract_strided_slice %1 {offsets = [0, 0, 0], sizes = [1, 8, 1], strides = [1, 1, 1]} : vector<9x8x1xf32> to vector<1x8x1xf32>
    %12 = vector.shape_cast %11 : vector<1x8x1xf32> to vector<8x1xf32>
    %13 = vector.broadcast %10 : vector<1x256xf32> to vector<8x256xf32>
    %14 = vector.broadcast %12 : vector<8x1xf32> to vector<8x256xf32>
    %15 = arith.mulf %13, %14 : vector<8x256xf32>
    %16 = vector.shape_cast %15 : vector<8x256xf32> to vector<1x8x256xf32>
    %17 = vector.broadcast %16 : vector<1x8x256xf32> to vector<2x8x256xf32>
    %18 = arith.mulf %9, %17 : vector<2x8x256xf32>
    %19 = arith.addf %8, %18 : vector<2x8x256xf32>
    %c16_i32 = arith.constant 16 : i32
    %20 = tpu.dynamic_rotate %0 by %c16_i32 dim 2 : vector<2x8x256xf32>, i32 -> vector<2x8x256xf32>
    %21 = vector.extract_strided_slice %3 {offsets = [1, 0], sizes = [1, 256], strides = [1, 1]} : vector<9x256xf32> to vector<1x256xf32>
    %22 = vector.extract_strided_slice %1 {offsets = [1, 0, 0], sizes = [1, 8, 1], strides = [1, 1, 1]} : vector<9x8x1xf32> to vector<1x8x1xf32>
    %23 = vector.shape_cast %22 : vector<1x8x1xf32> to vector<8x1xf32>
    %24 = vector.broadcast %21 : vector<1x256xf32> to vector<8x256xf32>
    %25 = vector.broadcast %23 : vector<8x1xf32> to vector<8x256xf32>
    %26 = arith.mulf %24, %25 : vector<8x256xf32>
    %27 = vector.shape_cast %26 : vector<8x256xf32> to vector<1x8x256xf32>
    %28 = vector.broadcast %27 : vector<1x8x256xf32> to vector<2x8x256xf32>
    %29 = arith.mulf %20, %28 : vector<2x8x256xf32>
    %30 = arith.addf %19, %29 : vector<2x8x256xf32>
    %c15_i32 = arith.constant 15 : i32
    %31 = tpu.dynamic_rotate %0 by %c15_i32 dim 2 : vector<2x8x256xf32>, i32 -> vector<2x8x256xf32>
    %32 = vector.extract_strided_slice %3 {offsets = [2, 0], sizes = [1, 256], strides = [1, 1]} : vector<9x256xf32> to vector<1x256xf32>
    %33 = vector.extract_strided_slice %1 {offsets = [2, 0, 0], sizes = [1, 8, 1], strides = [1, 1, 1]} : vector<9x8x1xf32> to vector<1x8x1xf32>
    %34 = vector.shape_cast %33 : vector<1x8x1xf32> to vector<8x1xf32>
    %35 = vector.broadcast %32 : vector<1x256xf32> to vector<8x256xf32>
    %36 = vector.broadcast %34 : vector<8x1xf32> to vector<8x256xf32>
    %37 = arith.mulf %35, %36 : vector<8x256xf32>
    %38 = vector.shape_cast %37 : vector<8x256xf32> to vector<1x8x256xf32>
    %39 = vector.broadcast %38 : vector<1x8x256xf32> to vector<2x8x256xf32>
    %40 = arith.mulf %31, %39 : vector<2x8x256xf32>
    %41 = arith.addf %30, %40 : vector<2x8x256xf32>
    %c1_i32 = arith.constant 1 : i32
    %42 = tpu.dynamic_rotate %0 by %c1_i32 dim 2 : vector<2x8x256xf32>, i32 -> vector<2x8x256xf32>
    %43 = vector.extract_strided_slice %3 {offsets = [3, 0], sizes = [1, 256], strides = [1, 1]} : vector<9x256xf32> to vector<1x256xf32>
    %44 = vector.extract_strided_slice %1 {offsets = [3, 0, 0], sizes = [1, 8, 1], strides = [1, 1, 1]} : vector<9x8x1xf32> to vector<1x8x1xf32>
    %45 = vector.shape_cast %44 : vector<1x8x1xf32> to vector<8x1xf32>
    %46 = vector.broadcast %43 : vector<1x256xf32> to vector<8x256xf32>
    %47 = vector.broadcast %45 : vector<8x1xf32> to vector<8x256xf32>
    %48 = arith.mulf %46, %47 : vector<8x256xf32>
    %49 = vector.shape_cast %48 : vector<8x256xf32> to vector<1x8x256xf32>
    %50 = vector.broadcast %49 : vector<1x8x256xf32> to vector<2x8x256xf32>
    %51 = arith.mulf %42, %50 : vector<2x8x256xf32>
    %52 = arith.addf %41, %51 : vector<2x8x256xf32>
    %c255_i32 = arith.constant 255 : i32
    %53 = tpu.dynamic_rotate %0 by %c255_i32 dim 2 : vector<2x8x256xf32>, i32 -> vector<2x8x256xf32>
    %54 = vector.extract_strided_slice %3 {offsets = [5, 0], sizes = [1, 256], strides = [1, 1]} : vector<9x256xf32> to vector<1x256xf32>
    %55 = vector.extract_strided_slice %1 {offsets = [5, 0, 0], sizes = [1, 8, 1], strides = [1, 1, 1]} : vector<9x8x1xf32> to vector<1x8x1xf32>
    %56 = vector.shape_cast %55 : vector<1x8x1xf32> to vector<8x1xf32>
    %57 = vector.broadcast %54 : vector<1x256xf32> to vector<8x256xf32>
    %58 = vector.broadcast %56 : vector<8x1xf32> to vector<8x256xf32>
    %59 = arith.mulf %57, %58 : vector<8x256xf32>
    %60 = vector.shape_cast %59 : vector<8x256xf32> to vector<1x8x256xf32>
    %61 = vector.broadcast %60 : vector<1x8x256xf32> to vector<2x8x256xf32>
    %62 = arith.mulf %53, %61 : vector<2x8x256xf32>
    %63 = arith.addf %52, %62 : vector<2x8x256xf32>
    %c241_i32 = arith.constant 241 : i32
    %64 = tpu.dynamic_rotate %0 by %c241_i32 dim 2 : vector<2x8x256xf32>, i32 -> vector<2x8x256xf32>
    %65 = vector.extract_strided_slice %3 {offsets = [6, 0], sizes = [1, 256], strides = [1, 1]} : vector<9x256xf32> to vector<1x256xf32>
    %66 = vector.extract_strided_slice %1 {offsets = [6, 0, 0], sizes = [1, 8, 1], strides = [1, 1, 1]} : vector<9x8x1xf32> to vector<1x8x1xf32>
    %67 = vector.shape_cast %66 : vector<1x8x1xf32> to vector<8x1xf32>
    %68 = vector.broadcast %65 : vector<1x256xf32> to vector<8x256xf32>
    %69 = vector.broadcast %67 : vector<8x1xf32> to vector<8x256xf32>
    %70 = arith.mulf %68, %69 : vector<8x256xf32>
    %71 = vector.shape_cast %70 : vector<8x256xf32> to vector<1x8x256xf32>
    %72 = vector.broadcast %71 : vector<1x8x256xf32> to vector<2x8x256xf32>
    %73 = arith.mulf %64, %72 : vector<2x8x256xf32>
    %74 = arith.addf %63, %73 : vector<2x8x256xf32>
    %c240_i32 = arith.constant 240 : i32
    %75 = tpu.dynamic_rotate %0 by %c240_i32 dim 2 : vector<2x8x256xf32>, i32 -> vector<2x8x256xf32>
    %76 = vector.extract_strided_slice %3 {offsets = [7, 0], sizes = [1, 256], strides = [1, 1]} : vector<9x256xf32> to vector<1x256xf32>
    %77 = vector.extract_strided_slice %1 {offsets = [7, 0, 0], sizes = [1, 8, 1], strides = [1, 1, 1]} : vector<9x8x1xf32> to vector<1x8x1xf32>
    %78 = vector.shape_cast %77 : vector<1x8x1xf32> to vector<8x1xf32>
    %79 = vector.broadcast %76 : vector<1x256xf32> to vector<8x256xf32>
    %80 = vector.broadcast %78 : vector<8x1xf32> to vector<8x256xf32>
    %81 = arith.mulf %79, %80 : vector<8x256xf32>
    %82 = vector.shape_cast %81 : vector<8x256xf32> to vector<1x8x256xf32>
    %83 = vector.broadcast %82 : vector<1x8x256xf32> to vector<2x8x256xf32>
    %84 = arith.mulf %75, %83 : vector<2x8x256xf32>
    %85 = arith.addf %74, %84 : vector<2x8x256xf32>
    %c239_i32 = arith.constant 239 : i32
    %86 = tpu.dynamic_rotate %0 by %c239_i32 dim 2 : vector<2x8x256xf32>, i32 -> vector<2x8x256xf32>
    %87 = vector.extract_strided_slice %3 {offsets = [8, 0], sizes = [1, 256], strides = [1, 1]} : vector<9x256xf32> to vector<1x256xf32>
    %88 = vector.extract_strided_slice %1 {offsets = [8, 0, 0], sizes = [1, 8, 1], strides = [1, 1, 1]} : vector<9x8x1xf32> to vector<1x8x1xf32>
    %89 = vector.shape_cast %88 : vector<1x8x1xf32> to vector<8x1xf32>
    %90 = vector.broadcast %87 : vector<1x256xf32> to vector<8x256xf32>
    %91 = vector.broadcast %89 : vector<8x1xf32> to vector<8x256xf32>
    %92 = arith.mulf %90, %91 : vector<8x256xf32>
    %93 = vector.shape_cast %92 : vector<8x256xf32> to vector<1x8x256xf32>
    %94 = vector.broadcast %93 : vector<1x8x256xf32> to vector<2x8x256xf32>
    %95 = arith.mulf %86, %94 : vector<2x8x256xf32>
    %96 = arith.addf %85, %95 : vector<2x8x256xf32>
    %cst = arith.constant dense<0.000000e+00> : vector<8xf32>
    %97 = vector.multi_reduction <add>, %96, %cst [0, 2] : vector<2x8x256xf32> to vector<8xf32>
    %98 = vector.shape_cast %97 : vector<8xf32> to vector<1x8x1xf32>
    %cst_7 = arith.constant 0.001953125 : f32
    %99 = vector.broadcast %cst_7 : f32 to vector<1x8x1xf32>
    %100 = arith.mulf %98, %99 : vector<1x8x1xf32>
    %101 = vector.broadcast %100 : vector<1x8x1xf32> to vector<2x8x256xf32>
    %102 = arith.subf %96, %101 : vector<2x8x256xf32>
    %103 = arith.mulf %102, %102 : vector<2x8x256xf32>
    %cst_8 = arith.constant dense<0.000000e+00> : vector<8xf32>
    %104 = vector.multi_reduction <add>, %103, %cst_8 [0, 2] : vector<2x8x256xf32> to vector<8xf32>
    %105 = vector.shape_cast %104 : vector<8xf32> to vector<1x8x1xf32>
    %cst_9 = arith.constant 0.001953125 : f32
    %106 = vector.broadcast %cst_9 : f32 to vector<1x8x1xf32>
    %107 = arith.mulf %105, %106 : vector<1x8x1xf32>
    %cst_10 = arith.constant 9.99999974E-6 : f32
    %108 = vector.broadcast %cst_10 : f32 to vector<1x8x1xf32>
    %109 = arith.addf %107, %108 : vector<1x8x1xf32>
    %110 = math.rsqrt %109 : vector<1x8x1xf32>
    %c0_11 = arith.constant 0 : index
    %c0_12 = arith.constant 0 : index
    %111 = vector.load %arg3[%c0_11, %c0_12] : memref<8x1xf32, #tpu.memory_space<vmem>>, vector<8x1xf32>
    %112 = vector.shape_cast %111 : vector<8x1xf32> to vector<1x8x1xf32>
    %113 = arith.mulf %110, %112 : vector<1x8x1xf32>
    %114 = vector.broadcast %113 : vector<1x8x1xf32> to vector<2x8x256xf32>
    %115 = arith.mulf %102, %114 : vector<2x8x256xf32>
    %c0_13 = arith.constant 0 : index
    %c0_14 = arith.constant 0 : index
    %116 = vector.load %arg4[%c0_13, %c0_14] : memref<8x1xf32, #tpu.memory_space<vmem>>, vector<8x1xf32>
    %117 = vector.shape_cast %116 : vector<8x1xf32> to vector<1x8x1xf32>
    %118 = vector.broadcast %117 : vector<1x8x1xf32> to vector<2x8x256xf32>
    %119 = arith.addf %115, %118 : vector<2x8x256xf32>
    %c0_15 = arith.constant 0 : index
    %c0_16 = arith.constant 0 : index
    %c0_17 = arith.constant 0 : index
    %120 = vector.load %arg1[%c0_15, %c0_16, %c0_17] : memref<2x8x256xf32, #tpu.memory_space<vmem>>, vector<2x8x256xf32>
    %121 = arith.subf %119, %120 : vector<2x8x256xf32>
    %122 = arith.negf %121 : vector<2x8x256xf32>
    %123 = math.exp %122 : vector<2x8x256xf32>
    %cst_18 = arith.constant 1.000000e+00 : f32
    %124 = vector.broadcast %cst_18 : f32 to vector<2x8x256xf32>
    %125 = arith.addf %124, %123 : vector<2x8x256xf32>
    %126 = arith.divf %124, %125 : vector<2x8x256xf32>
    %127 = arith.mulf %121, %126 : vector<2x8x256xf32>
    %128 = arith.addf %127, %120 : vector<2x8x256xf32>
    %c0_19 = arith.constant 0 : index
    %c0_20 = arith.constant 0 : index
    %c0_21 = arith.constant 0 : index
    %129 = vector.load %arg6[%c0_19, %c0_20, %c0_21] : memref<2x8x256xf32, #tpu.memory_space<vmem>>, vector<2x8x256xf32>
    tpu.vector_store %arg6[%c0_19, %c0_20, %c0_21], %128 {strides = array<i32>} : memref<2x8x256xf32, #tpu.memory_space<vmem>>, vector<2x8x256xf32>,
    return
  }
  func.func @transform_0(%arg0: i32) -> (i32, i32, i32) {
    %c0_i32 = arith.constant 0 : i32
    %c0_i32_0 = arith.constant 0 : i32
    %c0_i32_1 = arith.constant 0 : i32
    return %c0_i32, %arg0, %c0_i32_0 : i32, i32, i32
  }
  func.func @transform_1(%arg0: i32) -> (i32, i32, i32) {
    %c0_i32 = arith.constant 0 : i32
    %c0_i32_0 = arith.constant 0 : i32
    %c0_i32_1 = arith.constant 0 : i32
    return %c0_i32, %arg0, %c0_i32_0 : i32, i32, i32
  }
  func.func @transform_2(%arg0: i32) -> (i32, i32) {
    %c0_i32 = arith.constant 0 : i32
    %c0_i32_0 = arith.constant 0 : i32
    return %arg0, %c0_i32 : i32, i32
  }
  func.func @transform_3(%arg0: i32) -> (i32, i32) {
    %c0_i32 = arith.constant 0 : i32
    %c0_i32_0 = arith.constant 0 : i32
    return %arg0, %c0_i32 : i32, i32
  }
  func.func @transform_4(%arg0: i32) -> (i32, i32) {
    %c0_i32 = arith.constant 0 : i32
    %c0_i32_0 = arith.constant 0 : i32
    %c0_i32_1 = arith.constant 0 : i32
    return %c0_i32, %c0_i32_0 : i32, i32
  }
  func.func @transform_5(%arg0: i32) -> (i32, i32, i32) {
    %c0_i32 = arith.constant 0 : i32
    %c0_i32_0 = arith.constant 0 : i32
    %c0_i32_1 = arith.constant 0 : i32
    return %c0_i32, %arg0, %c0_i32_0 : i32, i32, i32
  }
}

</mosaic_0001>

<bundles_post_ra>
// kernel: tpu_custom_call.1
= control target key start
LH: loop header
LB: loop body
LE: loop exit
PB: predicated region body
PF: predicated region fallthrough
CT: control target
= control target key end

     0   :  { %10 = vsyncpa [#allocation3], 0  ;;  %s1074_s0 = inlined_call_operand.hbm [shape: f32[2,8,256], index: 0, kind: input, shape index: {}]   ;;  %s1075_s1 = inlined_call_operand.hbm [shape: f32[9,8,1], index: 1, kind: input, shape index: {}]   ;;  %s1076_s2 = inlined_call_operand.hbm [shape: f32[8,1], index: 2, kind: input, shape index: {}]   ;;  %s1077_s3 = inlined_call_operand.hbm [shape: f32[8,1], index: 3, kind: input, shape index: {}]   ;;  %s1078_s4 = inlined_call_operand.hbm [shape: bf16[9,256], index: 4, kind: input, shape index: {}]   ;;  %s1079_s5 = inlined_call_operand.hbm [shape: f32[2,8,256], index: 5, kind: output, shape index: {}]  }
   0x1   :  { %11 = vsyncpa [#allocation6], 0 }
   0x2   :  { %12 = vsyncpa [#allocation9], 0 }
   0x3   :  { %13 = vsyncpa [#allocation4], 0  ;;  %s687_s18 = smov [#allocation5]   ;;  %s547_s22 = scalar_lea.hbm %s1075_s1, 1152 }
   0x4   :  { %s31_s19 = sshll.u32 %s687_s18, 4  ;;  %p548_p0 = scmp.ne.s32.totalorder %s1075_s1, %s547_s22  ;;  %s32_s19 = int_to_ptr.vmem [resolvable:$true] %s31_s19 }
   0x5   :  { %p551_p1 = scmp.lt.u32.totalorder %s547_s22, %s1075_s1 }
   0x7   :  { %p553_p2 = pnand %p551_p1, %p548_p0 }
   0x9   :  { %556 = shalt.err (!%p553_p2)
}
   0xa   :  { %s557_s27 = scalar_lea.vmem %s32_s19, 1152  ;;  %p562_p4 = scmp.lt.s32.totalorder %s32_s19, %s32_s19 }
   0xb   :  { %p558_p3 = scmp.ne.s32.totalorder %s32_s19, %s557_s27  ;;  %p563_p5 = scmp.lt.s32.totalorder %s557_s27, %s557_s27 }
   0xd   :  { %p564_p6 = por %p563_p5, %p562_p4 }
   0xf   :  { %p565_p7 = pnand %p564_p6, %p558_p3 }
  0x11   :  { %568 = shalt.err (!%p565_p7)
}
  0x12   :  { %s688_s28 = smov 128   ;;  %s689_s29 = smov 8  }
  0x13   :  { %37 = dma.hbm_to_vmem [thread:$0]  %s1075_s1, 1152, %s32_s19, [#allocation6], %s688_s28, %s688_s28, %s689_s29  }
  0x14   :  { %s690_s7 = smov [#allocation8]   ;;  %s691_s9 = smov [#allocation2]  }
  0x15   :  { %s54_s8 = sshll.u32 %s690_s7, 4  ;;  %s19_s10 = sshll.u32 %s691_s9, 4  ;;  %s55_s8 = int_to_ptr.vmem [resolvable:$true] %s54_s8  ;;  %s20_s10 = int_to_ptr.vmem [resolvable:$true] %s19_s10 }
  0x16   :  { %s569_s13 = scalar_lea.hbm %s1077_s3, 128 }
  0x17   :  { %p570_p8 = scmp.ne.s32.totalorder %s1077_s3, %s569_s13  ;;  %p573_p9 = scmp.lt.u32.totalorder %s569_s13, %s1077_s3 }
  0x19   :  { %p575_p10 = pnand %p573_p9, %p570_p8 }
  0x1b   :  { %578 = shalt.err (!%p575_p10)
}
  0x1c   :  { %s579_s1 = scalar_lea.vmem %s55_s8, 128  ;;  %p584_p12 = scmp.lt.s32.totalorder %s55_s8, %s55_s8 }
  0x1d   :  { %p580_p11 = scmp.ne.s32.totalorder %s55_s8, %s579_s1  ;;  %p585_p13 = scmp.lt.s32.totalorder %s579_s1, %s579_s1 }
  0x1f   :  { %p586_p0 = por %p585_p13, %p584_p12 }
  0x21   :  { %p587_p1 = pnand %p586_p0, %p580_p11 }
  0x23   :  { %590 = shalt.err (!%p587_p1)
}
  0x24   :  { %57 = dma.hbm_to_vmem [thread:$0]  %s1077_s3, 128, %s55_s8, [#allocation9]  }
  0x25   :  { %s591_s22 = scalar_lea.hbm %s1074_s0, 512 }
  0x26   :  { %p592_p2 = scmp.ne.s32.totalorder %s1074_s0, %s591_s22  ;;  %p595_p3 = scmp.lt.u32.totalorder %s591_s22, %s1074_s0 }
  0x28   :  { %p597_p4 = pnand %p595_p3, %p592_p2 }
  0x2a   :  { %600 = shalt.err (!%p597_p4)
}
  0x2b   :  { %s601_s27 = scalar_lea.vmem %s20_s10, 512  ;;  %p606_p6 = scmp.lt.s32.totalorder %s20_s10, %s20_s10 }
  0x2c   :  { %p602_p5 = scmp.ne.s32.totalorder %s20_s10, %s601_s27  ;;  %p607_p7 = scmp.lt.s32.totalorder %s601_s27, %s601_s27 }
  0x2e   :  { %p608_p8 = por %p607_p7, %p606_p6 }
  0x30   :  { %p609_p9 = pnand %p608_p8, %p602_p5 }
  0x32   :  { %612 = shalt.err (!%p609_p9)
}
  0x33   :  { %s692_s3 = smov 256   ;;  %s693_s30 = smov 16  }
  0x34   :  { %25 = dma.hbm_to_vmem [thread:$0]  %s1074_s0, 512, %s20_s10, [#allocation3], %s692_s3, %s692_s3, %s693_s30  }
  0x35   :  { %s694_s8 = smov [#allocation7]   ;;  %s695_s11 = smov [#allocation10]  }
  0x36   :  { %s44_s9 = sshll.u32 %s694_s8, 4  ;;  %s63_s12 = sshll.u32 %s695_s11, 4  ;;  %s45_s9 = int_to_ptr.vmem [resolvable:$true] %s44_s9  ;;  %s64_s12 = int_to_ptr.vmem [resolvable:$true] %s63_s12 }
  0x37   :  { %s613_s15 = scalar_lea.hbm %s1076_s2, 128 }
  0x38   :  { %p614_p10 = scmp.ne.s32.totalorder %s1076_s2, %s613_s15  ;;  %p617_p11 = scmp.lt.u32.totalorder %s613_s15, %s1076_s2 }
  0x3a   :  { %p619_p12 = pnand %p617_p11, %p614_p10 }
  0x3c   :  { %622 = shalt.err (!%p619_p12)
}
  0x3d   :  { %s623_s0 = scalar_lea.vmem %s45_s9, 128  ;;  %p628_p0 = scmp.lt.s32.totalorder %s45_s9, %s45_s9 }
  0x3e   :  { %p624_p13 = scmp.ne.s32.totalorder %s45_s9, %s623_s0  ;;  %p629_p1 = scmp.lt.s32.totalorder %s623_s0, %s623_s0 }
  0x40   :  { %p630_p2 = por %p629_p1, %p628_p0 }
  0x42   :  { %p631_p3 = pnand %p630_p2, %p624_p13 }
  0x44   :  { %634 = shalt.err (!%p631_p3)
}
  0x45   :  { %47 = dma.hbm_to_vmem [thread:$0]  %s1076_s2, 128, %s45_s9, [#allocation6]  }
  0x46   :  { %s635_s22 = scalar_lea.hbm %s1078_s4, 256 }
  0x47   :  { %p636_p4 = scmp.ne.s32.totalorder %s1078_s4, %s635_s22  ;;  %p639_p5 = scmp.lt.u32.totalorder %s635_s22, %s1078_s4 }
  0x49   :  { %p641_p6 = pnand %p639_p5, %p636_p4 }
  0x4b   :  { %644 = shalt.err (!%p641_p6)
}
  0x4c   :  { %s645_s27 = scalar_lea.vmem %s64_s12, 256  ;;  %p650_p8 = scmp.lt.s32.totalorder %s64_s12, %s64_s12 }
  0x4d   :  { %p646_p7 = scmp.ne.s32.totalorder %s64_s12, %s645_s27  ;;  %p651_p9 = scmp.lt.s32.totalorder %s645_s27, %s645_s27 }
  0x4f   :  { %p652_p10 = por %p651_p9, %p650_p8 }
  0x51   :  { %p653_p11 = pnand %p652_p10, %p646_p7 }
  0x53   :  { %656 = shalt.err (!%p653_p11)
}
  0x54   :  { %69 = dma.hbm_to_vmem [thread:$0]  %s1078_s4, 256, %s64_s12, [#allocation9], %s688_s28, %s688_s28, %s689_s29  }
  0x55   :  { %679 = dma.done.wait [#allocation3], 512  }
  0x56   :  { %680 = vsyncadd [#allocation3], 4294966784 }
  0x57   :  { %681 = dma.done.wait [#allocation6], 1280  }
  0x58   :  { %682 = vsyncadd [#allocation6], 4294966016 }
  0x59   :  { %683 = dma.done.wait [#allocation9], 384  }
  0x5a   :  { %684 = vsyncadd [#allocation9], 4294966912  ;;  %v696_v0 = vmov 0   ;;  %v90_v1 = vld [vmem:[#allocation5 + $0x8] sm:$0xff]  ;;  %v89_v2 = vld [vmem:[#allocation5] sm:$0xff]  ;;  %s697_s4 = smov 17   ;;  %v121_v32 = vlaneseq }
  0x5b   :  { %528 = vset.pattern.permute.xlu1 %v696_v0  ;;  %527 = vset.pattern.permute.xlu0 %v696_v0  ;;  %v91_v3 = vld [vmem:[#allocation5 + $0x10] sm:$0xff]  ;;  %v93_v4 = vld [vmem:[#allocation5 + $0x20] sm:$0xff]  ;;  %v92_v5 = vld [vmem:[#allocation5 + $0x18] sm:$0xff]  ;;  %s698_s28 = smov 15   ;;  %s699_s29 = smov 1  }
  0x5c   :  { %174 = vperm.xlu1 %528, %v90_v1   ;;  %138 = vperm.xlu0 %527, %v89_v2   ;;  %v804_v6 = vld [vmem:[#allocation2] sm:$0xff]  ;;  %v807_v7 = vld [vmem:[#allocation2 + $0x8] sm:$0xff]  ;;  %v810_v9 = vld [vmem:[#allocation2 + $0x10] sm:$0xff]  ;;  %s700_s7 = smov 127   ;;  %s701_s8 = smov 113   ;;  %v129_v35 = vshrl.u32 %v121_v32, 7 }
  0x5d   :  { %v94_v8 = vld [vmem:[#allocation5 + $0x28] sm:$0xff]  ;;  %v812_v10 = vld [vmem:[#allocation2 + $0x18] sm:$0xff]  ;;  %v95_v11 = vld [vmem:[#allocation5 + $0x30] sm:$0xff]  ;;  %s702_s9 = smov 112   ;;  %s703_s11 = smov 111   ;;  %v892_v46 = vand.u32 127, %v121_v32 }
  0x5e   :  { %v96_v12 = vld [vmem:[#allocation5 + $0x38] sm:$0xff]  ;;  %v97_v13 = vld [vmem:[#allocation5 + $0x40] sm:$0xff]  ;;  %v166_v39 = vsub.s32 1, %v129_v35  ;;  %v130_v42 = vsub.s32 0, %v129_v35  ;;  %v202_v45 = vsub.s32 2, %v129_v35  ;;  %v238_v47 = vsub.s32 3, %v129_v35 }
  0x5f   :  { %v98_v38 = vld [vmem:[#allocation10] sm:$0xff]  ;;  %v274_v48 = vsub.s32 5, %v129_v35  ;;  %v99_v49 = vld [vmem:[#allocation10 + $0x8] sm:$0x11]  ;;  %v310_v51 = vsub.s32 6, %v129_v35  ;;  %v346_v55 = vsub.s32 7, %v129_v35 }
  0x60   :  { %210 = vperm.xlu1 %528, %v91_v3   ;;  %106 = vperm.xlu0 %527, %v93_v4   ;;  %v100_v40 = vunpack.c.l.bf16 %v98_v38  ;;  %v101_v41 = vunpack.c.h.bf16 %v98_v38  ;;  %v102_v60 = vunpack.c.l.bf16 %v99_v49  ;;  %v103_v61 = vunpack.c.h.bf16 %v99_v49  ;;  %s704_s12 = smov [#allocation11]  }
  0x61   :  { %vm123_vm0 = vcmp.lt.s32.totalorder %v892_v46, 17  ;;  %vm159_vm1 = vcmp.lt.s32.totalorder %v892_v46, 16  ;;  %vm195_vm2 = vcmp.lt.s32.totalorder %v892_v46, 15  ;;  %vm231_vm3 = vcmp.lt.s32.totalorder %v892_v46, 1  ;;  %s491_s13 = sshll.u32 %s704_s12, 4  ;;  %s492_s13 = int_to_ptr.vmem [resolvable:$true] %s491_s13 }
  0x62   :  { %v167_v50 = vrot.slane %v100_v40, %v166_v39  ;;  %v171_v52 = vrot.slane %v101_v41, %v166_v39  ;;  %v131_v53 = vrot.slane %v100_v40, %v130_v42  ;;  %v135_v54 = vrot.slane %v101_v41, %v130_v42  ;;  %s657_s14 = scalar_lea.vmem %s492_s13, 512  ;;  %p662_p13 = scmp.lt.s32.totalorder %s492_s13, %s492_s13 }
  0x63   :  { %v203_v58 = vrot.slane %v100_v40, %v202_v45  ;;  %v207_v59 = vrot.slane %v101_v41, %v202_v45  ;;  %v239_v62 = vrot.slane %v100_v40, %v238_v47  ;;  %v243_v63 = vrot.slane %v101_v41, %v238_v47  ;;  %p658_p12 = scmp.ne.s32.totalorder %s492_s13, %s657_s14  ;;  %p663_p0 = scmp.lt.s32.totalorder %s657_s14, %s657_s14 }
  0x64   :  { %246 = vperm.xlu0 %527, %v92_v5   ;;  %113 = vrot.lane.b32.xlu1 %v804_v6, %s697_s4  ;;  %v275_v0 = vrot.slane %v100_v40, %v274_v48  ;;  %v279_v1 = vrot.slane %v101_v41, %v274_v48  ;;  %v311_v2 = vrot.slane %v100_v40, %v310_v51  ;;  %vm267_vm4 = vcmp.lt.s32.totalorder %v892_v46, 127 }
  0x65   :  { %v900_v3 = vrot.slane %v101_v41, %v310_v51  ;;  %v903_v4 = vrot.slane %v100_v40, %v346_v55  ;;  %v905_v5 = vrot.slane %v101_v41, %v346_v55  ;;  %v916_v32 = vrot.slane %v102_v60, %v130_v42  ;;  %p664_p1 = por %p663_p0, %p662_p13 }
  0x66   :  { %v918_v35 = vrot.slane %v103_v61, %v130_v42  ;;  %vm303_vm5 = vcmp.lt.s32.totalorder %v892_v46, 113  ;;  %vm339_vm6 = vcmp.lt.s32.totalorder %v892_v46, 112  ;;  %vm375_vm7 = vcmp.lt.s32.totalorder %v892_v46, 111 }
  0x67   :  { %p665_p2 = pnand %p664_p1, %p658_p12 }
  0x68   :  { %117 = vrot.lane.b32.xlu0 %v807_v7, %s697_s4  ;;  %282 = vperm.xlu1 %528, %v94_v8  }
  0x6c   :  { %115 = vrot.lane.b32.xlu0 %v810_v9, %s697_s4  ;;  %119 = vrot.lane.b32.xlu1 %v812_v10, %s697_s4 }
  0x70   :  { %151 = vrot.lane.b32.xlu0 %v804_v6, %s693_s30  ;;  %155 = vrot.lane.b32.xlu1 %v807_v7, %s693_s30 }
  0x74   :  { %318 = vperm.xlu0 %527, %v95_v11   ;;  %153 = vrot.lane.b32.xlu1 %v810_v9, %s693_s30 }
  0x78   :  { %157 = vrot.lane.b32.xlu0 %v812_v10, %s693_s30  ;;  %187 = vrot.lane.b32.xlu1 %v804_v6, %s698_s28 }
  0x7c   :  { %191 = vrot.lane.b32.xlu0 %v807_v7, %s698_s28  ;;  %354 = vperm.xlu1 %528, %v96_v12  }
  0x80   :  { %189 = vrot.lane.b32.xlu0 %v810_v9, %s698_s28  ;;  %193 = vrot.lane.b32.xlu1 %v812_v10, %s698_s28 }
  0x84   :  { %223 = vrot.lane.b32.xlu0 %v804_v6, %s699_s29  ;;  %227 = vrot.lane.b32.xlu1 %v807_v7, %s699_s29 }
  0x88   :  { %390 = vperm.xlu0 %527, %v97_v13   ;;  %225 = vrot.lane.b32.xlu1 %v810_v9, %s699_s29 }
  0x8c   :  { %229 = vrot.lane.b32.xlu0 %v812_v10, %s699_s29  ;;  %259 = vrot.lane.b32.xlu1 %v804_v6, %s700_s7 }
  0x90   :  { %263 = vrot.lane.b32.xlu0 %v807_v7, %s700_s7  ;;  %261 = vrot.lane.b32.xlu1 %v810_v9, %s700_s7 }
  0x94   :  { %265 = vrot.lane.b32.xlu0 %v812_v10, %s700_s7  ;;  %295 = vrot.lane.b32.xlu1 %v804_v6, %s701_s8 }
  0x98   :  { %299 = vrot.lane.b32.xlu0 %v807_v7, %s701_s8  ;;  %297 = vrot.lane.b32.xlu1 %v810_v9, %s701_s8 }
  0x9c   :  { %301 = vrot.lane.b32.xlu0 %v812_v10, %s701_s8  ;;  %331 = vrot.lane.b32.xlu1 %v804_v6, %s702_s9 }
  0xa0   :  { %335 = vrot.lane.b32.xlu0 %v807_v7, %s702_s9  ;;  %333 = vrot.lane.b32.xlu1 %v810_v9, %s702_s9 }
  0xa4   :  { %337 = vrot.lane.b32.xlu0 %v812_v10, %s702_s9  ;;  %367 = vrot.lane.b32.xlu1 %v804_v6, %s703_s11 }
  0xa8   :  { %371 = vrot.lane.b32.xlu0 %v807_v7, %s703_s11  ;;  %369 = vrot.lane.b32.xlu1 %v810_v9, %s703_s11 }
  0xac   :  { %373 = vrot.lane.b32.xlu0 %v812_v10, %s703_s11 }
  0xdb   :  { %v848_v14 = vpop.permute.xlu1 %174  ;;  %v850_v15 = vpop.permute.xlu0 %138 }
  0xdc   :  { %v177_v38 = vmul.f32 %v848_v14, %v167_v50  ;;  %v178_v39 = vmul.f32 %v848_v14, %v171_v52  ;;  %v141_v40 = vmul.f32 %v850_v15, %v131_v53  ;;  %v142_v41 = vmul.f32 %v850_v15, %v135_v54 }
  0xdf   :  { %v852_v16 = vpop.permute.xlu1 %210  ;;  %v854_v17 = vpop.permute.xlu0 %106 }
  0xe0   :  { %v213_v45 = vmul.f32 %v852_v16, %v203_v58  ;;  %v214_v47 = vmul.f32 %v852_v16, %v207_v59  ;;  %v111_v50 = vmul.f32 %v854_v17, %v810_v9  ;;  %v112_v51 = vmul.f32 %v854_v17, %v812_v10 }
  0xe3   :  { %v856_v18 = vpop.permute.xlu0 %246  ;;  %v114_v19 = vpop.permute.xlu1 %113 }
  0xe4   :  { %v249_v54 = vmul.f32 %v856_v18, %v239_v62  ;;  %v250_v55 = vmul.f32 %v856_v18, %v243_v63 }
  0xe7   :  { %v118_v20 = vpop.permute.xlu0 %117  ;;  %v858_v21 = vpop.permute.xlu1 %282 }
  0xe8   :  { %v124_v12 = vsel %vm123_vm0, %v114_v19, %v118_v20  ;;  %v126_v13 = vsel %vm123_vm0, %v118_v20, %v114_v19  ;;  %v285_v61 = vmul.f32 %v858_v21, %v275_v0  ;;  %v286_v63 = vmul.f32 %v858_v21, %v279_v1 }
  0xe9   :  { %v143_v14 = vmul.f32 %v141_v40, %v126_v13  ;;  %v144_v42 = vmul.f32 %v142_v41, %v124_v12 }
  0xeb   :  { %v860_v22 = vpop.permute.xlu0 %115  ;;  %v862_v23 = vpop.permute.xlu1 %119 }
  0xec   :  { %v125_v19 = vsel %vm123_vm0, %v860_v22, %v862_v23  ;;  %v127_v20 = vsel %vm123_vm0, %v862_v23, %v860_v22  ;;  %v109_v22 = vmul.f32 %v854_v17, %v804_v6  ;;  %v110_v23 = vmul.f32 %v854_v17, %v807_v7 }
  0xed   :  { %v145_v52 = vmul.f32 %v141_v40, %v127_v20  ;;  %v146_v53 = vmul.f32 %v142_v41, %v125_v19 }
  0xee   :  { %v147_v59 = vadd.f32 %v143_v14, %v109_v22  ;;  %v148_v60 = vadd.f32 %v144_v42, %v110_v23 }
  0xef   :  { %v864_v24 = vpop.permute.xlu0 %151  ;;  %v866_v25 = vpop.permute.xlu1 %155  ;;  %v149_v0 = vadd.f32 %v145_v52, %v111_v50  ;;  %v150_v41 = vadd.f32 %v146_v53, %v112_v51 }
  0xf0   :  { %v160_v15 = vsel %vm159_vm1, %v864_v24, %v866_v25  ;;  %v162_v16 = vsel %vm159_vm1, %v866_v25, %v864_v24 }
  0xf1   :  { %v179_v58 = vmul.f32 %v177_v38, %v162_v16  ;;  %v180_v17 = vmul.f32 %v178_v39, %v160_v15 }
  0xf3   :  { %v868_v26 = vpop.permute.xlu0 %318  ;;  %v870_v27 = vpop.permute.xlu1 %153  ;;  %v184_v19 = vadd.f32 %v180_v17, %v148_v60 }
  0xf7   :  { %v872_v28 = vpop.permute.xlu0 %157  ;;  %v874_v29 = vpop.permute.xlu1 %187 }
  0xf8   :  { %v161_v24 = vsel %vm159_vm1, %v870_v27, %v872_v28  ;;  %v163_v25 = vsel %vm159_vm1, %v872_v28, %v870_v27 }
  0xf9   :  { %v181_v27 = vmul.f32 %v177_v38, %v163_v25  ;;  %v182_v28 = vmul.f32 %v178_v39, %v161_v24  ;;  %v183_v39 = vadd.f32 %v179_v58, %v147_v59 }
  0xfb   :  { %v876_v30 = vpop.permute.xlu0 %191  ;;  %v878_v31 = vpop.permute.xlu1 %354  ;;  %v186_v16 = vadd.f32 %v182_v28, %v150_v41 }
  0xfc   :  { %v198_v12 = vsel %vm195_vm2, %v876_v30, %v874_v29  ;;  %v196_v18 = vsel %vm195_vm2, %v874_v29, %v876_v30  ;;  %v321_v30 = vmul.f32 %v868_v26, %v311_v2  ;;  %v357_v23 = vmul.f32 %v878_v31, %v903_v4 }
  0xfd   :  { %v215_v20 = vmul.f32 %v213_v45, %v198_v12  ;;  %v216_v14 = vmul.f32 %v214_v47, %v196_v18  ;;  %v358_v2 = vmul.f32 %v878_v31, %v905_v5 }
  0xff   :  { %v880_v33 = vpop.permute.xlu0 %189  ;;  %v882_v34 = vpop.permute.xlu1 %193 }
 0x100   :  { %v199_v62 = vsel %vm195_vm2, %v882_v34, %v880_v33  ;;  %v197_v38 = vsel %vm195_vm2, %v880_v33, %v882_v34  ;;  %v322_v33 = vmul.f32 %v868_v26, %v900_v3  ;;  %v185_v34 = vadd.f32 %v181_v27, %v149_v0 }
 0x101   :  { %v217_v42 = vmul.f32 %v213_v45, %v199_v62  ;;  %v218_v22 = vmul.f32 %v214_v47, %v197_v38  ;;  %v220_v3 = vadd.f32 %v216_v14, %v184_v19 }
 0x103   :  { %v884_v36 = vpop.permute.xlu0 %223  ;;  %v886_v37 = vpop.permute.xlu1 %227  ;;  %v221_v4 = vadd.f32 %v217_v42, %v185_v34  ;;  %v222_v53 = vadd.f32 %v218_v22, %v186_v16 }
 0x104   :  { %v234_v29 = vsel %vm231_vm3, %v886_v37, %v884_v36  ;;  %v232_v21 = vsel %vm231_vm3, %v884_v36, %v886_v37  ;;  %v219_v37 = vadd.f32 %v215_v20, %v183_v39 }
 0x105   :  { %v251_v45 = vmul.f32 %v249_v54, %v234_v29  ;;  %v252_v50 = vmul.f32 %v250_v55, %v232_v21 }
 0x107   :  { %v888_v43 = vpop.permute.xlu0 %390  ;;  %v890_v44 = vpop.permute.xlu1 %225 }
 0x108   :  { %v393_v27 = vmul.f32 %v888_v43, %v916_v32  ;;  %v394_v32 = vmul.f32 %v888_v43, %v918_v35 }
 0x10b   :  { %v894_v56 = vpop.permute.xlu0 %229  ;;  %v896_v57 = vpop.permute.xlu1 %259 }
 0x10c   :  { %v235_v26 = vsel %vm231_vm3, %v894_v56, %v890_v44  ;;  %v233_v5 = vsel %vm231_vm3, %v890_v44, %v894_v56  ;;  %v256_v56 = vadd.f32 %v252_v50, %v220_v3 }
 0x10d   :  { %v253_v58 = vmul.f32 %v249_v54, %v235_v26  ;;  %v254_v59 = vmul.f32 %v250_v55, %v233_v5 }
 0x10f   :  { %v908_v8 = vpop.permute.xlu0 %263  ;;  %v910_v11 = vpop.permute.xlu1 %261  ;;  %v257_v38 = vadd.f32 %v253_v58, %v221_v4  ;;  %v258_v20 = vadd.f32 %v254_v59, %v222_v53 }
 0x110   :  { %v268_v36 = vsel %vm267_vm4, %v896_v57, %v908_v8  ;;  %v270_v31 = vsel %vm267_vm4, %v908_v8, %v896_v57  ;;  %v255_v8 = vadd.f32 %v251_v45, %v219_v37 }
 0x111   :  { %v287_v24 = vmul.f32 %v285_v61, %v268_v36  ;;  %v288_v17 = vmul.f32 %v286_v63, %v270_v31 }
 0x113   :  { %v943_v48 = vpop.permute.xlu0 %265  ;;  %v296_v49 = vpop.permute.xlu1 %295  ;;  %v291_v62 = vadd.f32 %v287_v24, %v255_v8  ;;  %v292_v39 = vadd.f32 %v288_v17, %v256_v56 }
 0x114   :  { %v269_v25 = vsel %vm267_vm4, %v910_v11, %v943_v48 }
 0x117   :  { %v300_v13 = vpop.permute.xlu0 %299  ;;  %v298_v40 = vpop.permute.xlu1 %297 }
 0x118   :  { %v304_v47 = vsel %vm303_vm5, %v296_v49, %v300_v13  ;;  %v306_v57 = vsel %vm303_vm5, %v300_v13, %v296_v49  ;;  %v271_v49 = vsel %vm267_vm4, %v943_v48, %v910_v11  ;;  %v289_v13 = vmul.f32 %v285_v61, %v269_v25 }
 0x119   :  { %v323_v60 = vmul.f32 %v321_v30, %v304_v47  ;;  %v324_v54 = vmul.f32 %v322_v33, %v306_v57  ;;  %v290_v11 = vmul.f32 %v286_v63, %v271_v49 }
 0x11a   :  { %v293_v29 = vadd.f32 %v289_v13, %v257_v38 }
 0x11b   :  { %v302_v1 = vpop.permute.xlu0 %301  ;;  %v332_v15 = vpop.permute.xlu1 %331  ;;  %v327_v48 = vadd.f32 %v323_v60, %v291_v62  ;;  %v328_v14 = vadd.f32 %v324_v54, %v292_v39  ;;  %v294_v36 = vadd.f32 %v290_v11, %v258_v20 }
 0x11c   :  { %v305_v55 = vsel %vm303_vm5, %v298_v40, %v302_v1  ;;  %v307_v0 = vsel %vm303_vm5, %v302_v1, %v298_v40 }
 0x11d   :  { %v325_v42 = vmul.f32 %v321_v30, %v305_v55  ;;  %v326_v21 = vmul.f32 %v322_v33, %v307_v0  ;;  %v425_v55 = vld [vmem:[#allocation7] sm:$0xff] }
 0x11f   :  { %v336_v51 = vpop.permute.xlu0 %335  ;;  %v334_v52 = vpop.permute.xlu1 %333  ;;  %v329_v37 = vadd.f32 %v325_v42, %v293_v29  ;;  %v330_v4 = vadd.f32 %v326_v21, %v294_v36 }
 0x120   :  { %v340_v44 = vsel %vm339_vm6, %v332_v15, %v336_v51  ;;  %v342_v12 = vsel %vm339_vm6, %v336_v51, %v332_v15 }
 0x121   :  { %v359_v41 = vmul.f32 %v357_v23, %v340_v44  ;;  %v360_v19 = vmul.f32 %v358_v2, %v342_v12 }
 0x123   :  { %v338_v28 = vpop.permute.xlu0 %337  ;;  %v368_v18 = vpop.permute.xlu1 %367  ;;  %v363_v34 = vadd.f32 %v359_v41, %v327_v48  ;;  %v364_v63 = vadd.f32 %v360_v19, %v328_v14 }
 0x124   :  { %v341_v61 = vsel %vm339_vm6, %v334_v52, %v338_v28  ;;  %v343_v40 = vsel %vm339_vm6, %v338_v28, %v334_v52 }
 0x125   :  { %v361_v1 = vmul.f32 %v357_v23, %v341_v61  ;;  %v362_v30 = vmul.f32 %v358_v2, %v343_v40  ;;  %v436_v2 = vld [vmem:[#allocation8] sm:$0xff] }
 0x127   :  { %v372_v15 = vpop.permute.xlu0 %371  ;;  %v370_v45 = vpop.permute.xlu1 %369  ;;  %v365_v5 = vadd.f32 %v361_v1, %v329_v37  ;;  %v366_v23 = vadd.f32 %v362_v30, %v330_v4 }
 0x128   :  { %v376_v43 = vsel %vm375_vm7, %v368_v18, %v372_v15  ;;  %v378_v35 = vsel %vm375_vm7, %v372_v15, %v368_v18 }
 0x129   :  { %v395_v16 = vmul.f32 %v393_v27, %v376_v43  ;;  %v396_v22 = vmul.f32 %v394_v32, %v378_v35 }
 0x12b   :  { %v399_v33 = vadd.f32 %v395_v16, %v363_v34  ;;  %v400_v50 = vadd.f32 %v396_v22, %v364_v63  ;;  %v374_v26 = vpop.permute.xlu0 %373 }
 0x12c   :  { %v377_v31 = vsel %vm375_vm7, %v370_v45, %v374_v26  ;;  %v379_v3 = vsel %vm375_vm7, %v374_v26, %v370_v45 }
 0x12d   :  { %v397_v47 = vmul.f32 %v393_v27, %v377_v31  ;;  %v398_v51 = vmul.f32 %v394_v32, %v379_v3  ;;  %v403_v53 = vadd.f32 %v400_v50, %v399_v33 }
 0x12f   :  { %v401_v52 = vadd.f32 %v397_v47, %v365_v5  ;;  %v402_v24 = vadd.f32 %v398_v51, %v366_v23 }
 0x131   :  { %v404_v25 = vadd.f32 %v403_v53, %v401_v52 }
 0x133   :  { %v405_v57 = vadd.f32 %v404_v25, %v402_v24 }
 0x135   :  { %406 = vadd.xlane.f32.xlu1 %v405_v57 }
 0x146   :  { %439 = vperm.xlu1 %528, %v436_v2  }
 0x1c2   :  { %v407_v8 = vpop.xlane.xlu1 %406 }
 0x1c3   :  { %v408_v58 = vmul.f32 0.001953125, %v407_v8 }
 0x1c5   :  { %v409_v17 = vsub.f32 %v399_v33, %v408_v58  ;;  %v410_v44 = vsub.f32 %v400_v50, %v408_v58  ;;  %v411_v56 = vsub.f32 %v401_v52, %v408_v58  ;;  %v412_v46 = vsub.f32 %v402_v24, %v408_v58 }
 0x1c6   :  { %v440_v11 = vpop.permute.xlu1 %439 }
 0x1c7   :  { %v413_v59 = vmul.f32 %v409_v17, %v409_v17  ;;  %v414_v60 = vmul.f32 %v410_v44, %v410_v44  ;;  %v415_v12 = vmul.f32 %v411_v56, %v411_v56  ;;  %v416_v49 = vmul.f32 %v412_v46, %v412_v46 }
 0x1c9   :  { %v417_v27 = vadd.f32 %v414_v60, %v413_v59 }
 0x1cb   :  { %v418_v13 = vadd.f32 %v417_v27, %v415_v12 }
 0x1cd   :  { %v419_v54 = vadd.f32 %v418_v13, %v416_v49 }
 0x1cf   :  { %420 = vadd.xlane.f32.xlu0 %v419_v54 }
 0x25c   :  { %v421_v28 = vpop.xlane.xlu0 %420 }
 0x25d   :  { %v422_v18 = vmul.f32 0.001953125, %v421_v28 }
 0x25f   :  { %v423_v62 = vadd.f32 1e-05, %v422_v18 }
 0x261   :  { %529 = vrsqrt.f32 %v423_v62 }
 0x26b   :  { %v530_v0 = vpop.eup %529 }
 0x26c   :  { %v426_v41 = vmul.f32 %v530_v0, %v425_v55 }
 0x26e   :  { %429 = vperm.xlu0 %527, %v426_v41  }
 0x2ed   :  { %v430_v32 = vpop.permute.xlu0 %429 }
 0x2ee   :  { %v432_v38 = vmul.f32 %v430_v32, %v409_v17  ;;  %v433_v39 = vmul.f32 %v430_v32, %v410_v44  ;;  %v434_v19 = vmul.f32 %v430_v32, %v411_v56  ;;  %v435_v20 = vmul.f32 %v430_v32, %v412_v46 }
 0x2f0   :  { %v442_v48 = vadd.f32 %v440_v11, %v432_v38  ;;  %v443_v61 = vadd.f32 %v440_v11, %v433_v39  ;;  %v444_v29 = vadd.f32 %v440_v11, %v434_v19  ;;  %v445_v14 = vadd.f32 %v440_v11, %v435_v20 }
 0x2f2   :  { %v446_v42 = vsub.f32 %v442_v48, %v804_v6  ;;  %v447_v21 = vsub.f32 %v443_v61, %v807_v7  ;;  %v448_v15 = vsub.f32 %v444_v29, %v810_v9  ;;  %v449_v34 = vsub.f32 %v445_v14, %v812_v10 }
 0x2f4   :  { %v505_v40 = vmul.f32 -1.442695, %v446_v42  ;;  %v506_v43 = vmul.f32 -1.442695, %v447_v21  ;;  %v507_v35 = vmul.f32 -1.442695, %v448_v15 }
 0x2f5   :  { %v508_v63 = vmul.f32 -1.442695, %v449_v34 }
 0x2f6   :  { %531 = vpow2.f32 %v505_v40 }
 0x2f7   :  { %533 = vpow2.f32 %v506_v43 }
 0x2f8   :  { %535 = vpow2.f32 %v507_v35 }
 0x2f9   :  { %537 = vpow2.f32 %v508_v63 }
 0x300   :  { %v532_v1 = vpop.eup %531 }
 0x301   :  { %v534_v16 = vpop.eup %533  ;;  %v462_v22 = vadd.f32 1.0, %v532_v1 }
 0x302   :  { %v536_v45 = vpop.eup %535  ;;  %v463_v36 = vadd.f32 1.0, %v534_v16 }
 0x303   :  { %v538_v37 = vpop.eup %537  ;;  %v464_v30 = vadd.f32 1.0, %v536_v45  ;;  %539 = vrcp.f32 %v462_v22 }
 0x304   :  { %v465_v33 = vadd.f32 1.0, %v538_v37  ;;  %541 = vrcp.f32 %v463_v36 }
 0x305   :  { %543 = vrcp.f32 %v464_v30 }
 0x306   :  { %545 = vrcp.f32 %v465_v33 }
 0x30d   :  { %v540_v50 = vpop.eup %539 }
 0x30e   :  { %v542_v26 = vpop.eup %541  ;;  %v474_v31 = vmul.f32 %v540_v50, %v446_v42 }
 0x30f   :  { %v544_v3 = vpop.eup %543  ;;  %v475_v4 = vmul.f32 %v542_v26, %v447_v21 }
 0x310   :  { %v546_v5 = vpop.eup %545  ;;  %v476_v47 = vmul.f32 %v544_v3, %v448_v15  ;;  %v478_v51 = vadd.f32 %v474_v31, %v804_v6 }
 0x311   :  { %v477_v23 = vmul.f32 %v546_v5, %v449_v34  ;;  %v479_v52 = vadd.f32 %v475_v4, %v807_v7 }
 0x312   :  { %v480_v53 = vadd.f32 %v476_v47, %v810_v9  ;;  %482 = vst [vmem:[#allocation11] sm:$0xff] %v478_v51 }
 0x313   :  { %v481_v24 = vadd.f32 %v477_v23, %v812_v10  ;;  %483 = vst [vmem:[#allocation11 + $0x8] sm:$0xff] %v479_v52 }
 0x314   :  { %484 = vst [vmem:[#allocation11 + $0x10] sm:$0xff] %v480_v53 }
 0x315   :  { %485 = vst [vmem:[#allocation11 + $0x18] sm:$0xff] %v481_v24 }
 0x316   :  { %668 = shalt.err (!%p665_p2)
}
 0x317   :  { %s669_s17 = scalar_lea.hbm %s1079_s5, 512 }
 0x318   :  { %p670_p3 = scmp.ne.s32.totalorder %s1079_s5, %s669_s17  ;;  %p673_p4 = scmp.lt.u32.totalorder %s669_s17, %s1079_s5 }
 0x31a   :  { %p675_p5 = pnand %p673_p4, %p670_p3 }
 0x31c   :  { %678 = shalt.err (!%p675_p5)
}
 0x31d   :  { %497 = dma.vmem_to_hbm [thread:$0]  %s492_s13, 512, %s1079_s5, [#allocation4], %s692_s3, %s692_s3, %s693_s30  }
 0x31e   :  { %685 = dma.done.wait [#allocation4], 512  }
 0x31f   :  { %686 = vsyncadd [#allocation4], 4294966784 }
 0x320   :  { %501 = vsyncpa [#allocation3], 1 }
 0x321   :  { %502 = vsyncpa [#allocation6], 1 }
 0x322   :  { %503 = vsyncpa [#allocation9], 1 }
 0x323   :  { %504 = vsyncpa [#allocation4], 1 }

</bundles_post_ra>
